<compile_context>
chip_gen: v5e
topology: v5e:2x2
jax: 0.10.0
libtpu: 0.0.40
codegen_flags: <defaults>
</compile_context>

<pallas_src>
import functools

import jax
import jax.numpy as jnp
from jax.experimental import pallas as pl
from jax.experimental.pallas import tpu as pltpu

LANE = 128
MAX_TILE_ROWS = 2048          # 2048 rows x 128 lanes = 256K pixels per grid step
_MIB = 1024 * 1024


def _cdiv(a, b):
    return (a + b - 1) // b


def _round_up(x, m):
    return _cdiv(x, m) * m


# ---------- elementwise helpers over a (C, rows, 128) channel-major slab ----------

def _channel_argmax(x):
    """First-occurrence argmax (and max) over axis 0 via unrolled VPU ops."""
    best = x[0]
    idx = jnp.zeros(best.shape, jnp.int32)
    for c in range(1, x.shape[0]):
        v = x[c]
        take = v > best
        best = jnp.where(take, v, best)
        idx = jnp.where(take, jnp.int32(c), idx)
    return idx, best


def _channel_max(x):
    m = x[0]
    for c in range(1, x.shape[0]):
        m = jnp.maximum(m, x[c])
    return m


# ---------- pass 1: per-batch class-occurrence counts of the CNN argmax ----------

def _class_count_kernel(cnn_ref, counts_ref, acc_ref, *, classes):
    s = pl.program_id(2)                      # spatial reduction axis ('arbitrary')

    @pl.when(s == 0)
    def _():
        acc_ref[...] = jnp.zeros_like(acc_ref)

    x = cnn_ref[0].astype(jnp.float32)        # (C, tile_rows, 128)
    cla, _ = _channel_argmax(x)               # (tile_rows, 128) int32

    # Elementwise one-hot accumulation for classes 1..classes (class 0 is never
    # counted, which also makes the zero-padded pixels free). Hides under DMA.
    for c in range(classes):
        acc_ref[c] += (cla == (c + 1)).astype(jnp.int32)

    @pl.when(s == pl.num_programs(2) - 1)
    def _():
        # cross-lane reductions only in the epilogue, int32 so counts are exact
        lane_sum = jnp.sum(acc_ref[...], axis=2, keepdims=True)   # (classes, tr, 1)
        tot = jnp.sum(lane_sum, axis=1, keepdims=True)            # (classes, 1, 1)
        counts_ref[...] = tot[None]                               # (1, classes, 1, 1)


# ---------- pass 2: per-pixel confidence-masked cross entropy ----------

def _masked_ce_kernel(mc_ref, inv_th_ref, cnn_ref, sam_ref, out_ref):
    b = pl.program_id(0)
    mc = mc_ref[b]                            # per-batch pseudo class in 1..classes
    inv_th = inv_th_ref[0]                    # 1 / threshold (precomputed on host)

    cnn = cnn_ref[0].astype(jnp.float32)      # (C,  tile_rows, 128)
    sam = sam_ref[0].astype(jnp.float32)      # (Cs, tile_rows, 128)
    n_sam = sam.shape[0]

    # --- SAM pseudo-label + confidence gate --------------------------------
    # max softmax prob >= th   <=>   sum_c exp(sam_c - smax) <= 1/th   (no divide)
    if n_sam == 2:                            # common case: skip the exp(0) term
        s0, s1 = sam[0], sam[1]
        take1 = s1 > s0
        midx = take1.astype(jnp.int32)
        smax = jnp.where(take1, s1, s0)
        smin = jnp.where(take1, s0, s1)
        se_s = 1.0 + jnp.exp(smin - smax)
    else:
        midx, smax = _channel_argmax(sam)
        se_s = jnp.zeros_like(smax)
        for c in range(n_sam):
            se_s = se_s + jnp.exp(sam[c] - smax)
    keep = (se_s <= inv_th).astype(jnp.float32)

    target = midx * mc                        # (tile_rows, 128) int32

    # --- numerically stable per-pixel NLL at channel `target` --------------
    cmax = _channel_max(cnn)
    z0 = cnn[0] - cmax
    se = jnp.exp(z0)
    zt = z0                                   # default: target == 0
    for c in range(1, cnn.shape[0]):
        zc = cnn[c] - cmax
        se = se + jnp.exp(zc)
        zt = jnp.where(target == c, zc, zt)
    loss = (jnp.log(se) - zt) * keep

    out_ref[...] = loss[None]                 # (1, tile_rows, 128)


# ---------- wrapper ----------

def sam_semi_supervised_loss(cnn_pred, sam_pred, threshold, *, classes=2):
    B, C, H, W = cnn_pred.shape
    Bs, Cs, Hs, Ws = sam_pred.shape
    assert (B, H, W) == (Bs, Hs, Ws)
    # target = mask_class * argmax(sam) must be a valid cnn channel index
    assert classes * (Cs - 1) <= C - 1, (
        "mask_class * argmax(sam_pred) would index past cnn_pred's channels")
    S = H * W

    # --- one-time lane-dense re-layout: spatial -> (rows, 128) -------------
    rows = _cdiv(S, LANE)
    # even tile count so pass 1 can split its reduction across 2 TCs (v7x)
    n_tiles = max(2, 2 * _cdiv(_cdiv(rows, MAX_TILE_ROWS), 2))
    tile_rows = _round_up(_cdiv(rows, n_tiles), 8)
    rows_pad = n_tiles * tile_rows
    s_pad = rows_pad * LANE

    def to_slabs(x, ch):
        x = x.reshape(B, ch, S)
        if s_pad != S:
            # zero padding: argmax -> class 0 (never counted); benign in pass 2
            x = jnp.pad(x, ((0, 0), (0, 0), (0, s_pad - S)))
        return x.reshape(B, ch, rows_pad, LANE)

    cnn4 = to_slabs(cnn_pred, C)
    sam4 = to_slabs(sam_pred, Cs)

    blk_px = tile_rows * LANE
    cnn_blk = C * blk_px * cnn_pred.dtype.itemsize
    sam_blk = Cs * blk_px * sam_pred.dtype.itemsize
    out_blk = blk_px * 4

    def vmem_limit(need_bytes):
        return int(min(64 * _MIB, max(32 * _MIB, 2 * need_bytes)))

    # --- pass 1: counts[b, c-1] = #{pixels : argmax_c cnn == c}, c in 1..classes
    n_half = n_tiles // 2
    counts = pl.pallas_call(
        functools.partial(_class_count_kernel, classes=classes),
        out_shape=jax.ShapeDtypeStruct((2 * B, classes, 1, 1), jnp.int32),
        grid_spec=pltpu.PrefetchScalarGridSpec(
            num_scalar_prefetch=0,
            grid=(2, B, n_half),
            in_specs=[pl.BlockSpec((1, C, tile_rows, LANE),
                                   lambda h, b, s: (b, 0, h * n_half + s, 0))],
            out_specs=pl.BlockSpec((1, classes, 1, 1),
                                   lambda h, b, s: (h * B + b, 0, 0, 0)),
            scratch_shapes=[pltpu.VMEM((classes, tile_rows, LANE), jnp.int32)],
        ),
        compiler_params=pltpu.CompilerParams(
            dimension_semantics=("parallel", "parallel", "arbitrary"),
            vmem_limit_bytes=vmem_limit(2 * cnn_blk + classes * blk_px * 4),
        ),
    )(cnn4)

    # tiny [B, classes] epilogue in plain JAX: dominant foreground class per batch
    counts = counts.reshape(2, B, classes).sum(axis=0)                # [B, classes]
    mask_class = (jnp.argmax(counts, axis=1) + 1).astype(jnp.int32)   # [B]
    inv_th = (1.0 / jnp.asarray(threshold, jnp.float32)).reshape(1)

    # --- pass 2: per-pixel CE at target = mask_class * sam_argmax, conf-gated
    # NOTE: pipeline_mode=pl.Buffered(3) on the inputs is only worth it if a v7x
    # profile shows exposed DMA; default double buffering is kept here.
    loss = pl.pallas_call(
        _masked_ce_kernel,
        out_shape=jax.ShapeDtypeStruct((B, rows_pad, LANE), jnp.float32),
        grid_spec=pltpu.PrefetchScalarGridSpec(
            num_scalar_prefetch=2,
            grid=(B, n_tiles),
            in_specs=[
                pl.BlockSpec((1, C, tile_rows, LANE),
                             lambda b, s, mc, th: (b, 0, s, 0)),
                pl.BlockSpec((1, Cs, tile_rows, LANE),
                             lambda b, s, mc, th: (b, 0, s, 0)),
            ],
            out_specs=pl.BlockSpec((1, tile_rows, LANE),
                                   lambda b, s, mc, th: (b, s, 0)),
        ),
        compiler_params=pltpu.CompilerParams(
            dimension_semantics=("parallel", "parallel"),
            vmem_limit_bytes=vmem_limit(2 * (cnn_blk + sam_blk + out_blk)),
        ),
    )(mask_class, inv_th, cnn4, sam4)

    return loss.reshape(B, s_pad)[:, :S].reshape(B, H, W)


# ---------- pure-JAX reference (mirrors the PyTorch module) ----------

def _ref_loss(cnn_pred, sam_pred, threshold, classes):
    B = cnn_pred.shape[0]
    mask = jnp.argmax(sam_pred, axis=1)
    cla = jnp.argmax(cnn_pred, axis=1).reshape(B, -1)
    counts = jnp.stack(
        [jnp.sum((cla == c).astype(jnp.int32), axis=1) for c in range(1, classes + 1)],
        axis=1)
    mask_class = (jnp.argmax(counts, axis=1) + 1).reshape(B, 1, 1)
    target = mask_class * mask
    logp = jax.nn.log_softmax(cnn_pred.astype(jnp.float32), axis=1)
    nll = -jnp.take_along_axis(logp, target[:, None, :, :], axis=1)[:, 0]
    sam_conf = jnp.max(jax.nn.softmax(sam_pred.astype(jnp.float32), axis=1), axis=1)
    return nll * (sam_conf >= threshold).astype(nll.dtype)


if __name__ == "__main__":
    B, CLASSES, H, W = 2, 2, 16, 16
    C_CNN, C_SAM = CLASSES + 1, 2
    THRESH = 0.75

    key = jax.random.PRNGKey(0)
    k1, k2 = jax.random.split(key)
    cnn_pred = jax.random.normal(k1, (B, C_CNN, H, W), dtype=jnp.float32)
    sam_pred = 2.0 * jax.random.normal(k2, (B, C_SAM, H, W), dtype=jnp.float32)

    run = jax.jit(functools.partial(sam_semi_supervised_loss, classes=CLASSES))
    loss = jax.block_until_ready(run(cnn_pred, sam_pred, THRESH))
    ref = jax.block_until_ready(_ref_loss(cnn_pred, sam_pred, THRESH, CLASSES))

    assert loss.shape == (B, H, W), loss.shape
    assert jnp.allclose(loss, ref, atol=1e-5, rtol=1e-5), (
        "max abs err", float(jnp.max(jnp.abs(loss - ref))))
    print("KERNEL_OK")
</pallas_src>

<mosaic_0001>
module attributes {stable_mosaic.version = 11 : i64} {
  func.func @_class_count_kernel(%arg0: i32, %arg1: i32, %arg2: i32, %arg3: memref<1x3x8x128xf32, #tpu.memory_space<vmem>>, %arg4: memref<1x2x1x1xi32, #tpu.memory_space<vmem>>, %arg5: memref<2x8x128xi32, #tpu.memory_space<vmem>>) attributes {dimension_semantics = [#tpu.dimension_semantics<parallel>, #tpu.dimension_semantics<parallel>, #tpu.dimension_semantics<arbitrary>], iteration_bounds = array<i64: 2, 2, 1>, scalar_prefetch = 0 : i64, scratch_operands = 1 : i64, tpu.core_type = #tpu.core_type<tc>, window_params = [{transform_indices = @transform_0, window_bounds = array<i64: 1, 3, 8, 128>}, {transform_indices = @transform_1, window_bounds = array<i64: 1, 2, 1, 1>}]} {
    %c0_i32 = arith.constant 0 : i32
    %0 = arith.cmpi eq, %arg2, %c0_i32 : i32
    %1 = arith.extui %0 : i1 to i32
    %c0_i32_0 = arith.constant 0 : i32
    %2 = arith.cmpi ne, %1, %c0_i32_0 : i32
    scf.if %2 {
      %c0_i32_20 = arith.constant 0 : i32
      %40 = vector.broadcast %c0_i32_20 : i32 to vector<2x8x128xi32>
      %c0_21 = arith.constant 0 : index
      %c0_22 = arith.constant 0 : index
      %c0_23 = arith.constant 0 : index
      %41 = vector.load %arg5[%c0_21, %c0_22, %c0_23] : memref<2x8x128xi32, #tpu.memory_space<vmem>>, vector<2x8x128xi32>
      tpu.vector_store %arg5[%c0_21, %c0_22, %c0_23], %40 {strides = array<i32>} : memref<2x8x128xi32, #tpu.memory_space<vmem>>, vector<2x8x128xi32>,
    } else {
    }
    %c0 = arith.constant 0 : index
    %c0_1 = arith.constant 0 : index
    %c0_2 = arith.constant 0 : index
    %c0_3 = arith.constant 0 : index
    %3 = vector.load %arg3[%c0, %c0_1, %c0_2, %c0_3] : memref<1x3x8x128xf32, #tpu.memory_space<vmem>>, vector<1x3x8x128xf32>
    %4 = vector.shape_cast %3 : vector<1x3x8x128xf32> to vector<3x8x128xf32>
    %5 = vector.extract_strided_slice %4 {offsets = [0, 0, 0], sizes = [1, 8, 128], strides = [1, 1, 1]} : vector<3x8x128xf32> to vector<1x8x128xf32>
    %6 = vector.shape_cast %5 : vector<1x8x128xf32> to vector<8x128xf32>
    %c0_i32_4 = arith.constant 0 : i32
    %7 = vector.broadcast %c0_i32_4 : i32 to vector<8x128xi32>
    %8 = vector.extract_strided_slice %4 {offsets = [1, 0, 0], sizes = [1, 8, 128], strides = [1, 1, 1]} : vector<3x8x128xf32> to vector<1x8x128xf32>
    %9 = vector.shape_cast %8 : vector<1x8x128xf32> to vector<8x128xf32>
    %10 = arith.cmpf ogt, %9, %6 : vector<8x128xf32>
    %11 = arith.select %10, %9, %6 : vector<8x128xi1>, vector<8x128xf32>
    %c1_i32 = arith.constant 1 : i32
    %12 = vector.broadcast %c1_i32 : i32 to vector<8x128xi32>
    %13 = arith.select %10, %12, %7 : vector<8x128xi1>, vector<8x128xi32>
    %14 = vector.extract_strided_slice %4 {offsets = [2, 0, 0], sizes = [1, 8, 128], strides = [1, 1, 1]} : vector<3x8x128xf32> to vector<1x8x128xf32>
    %15 = vector.shape_cast %14 : vector<1x8x128xf32> to vector<8x128xf32>
    %16 = arith.cmpf ogt, %15, %11 : vector<8x128xf32>
    %c2_i32 = arith.constant 2 : i32
    %17 = vector.broadcast %c2_i32 : i32 to vector<8x128xi32>
    %18 = arith.select %16, %17, %13 : vector<8x128xi1>, vector<8x128xi32>
    %c0_5 = arith.constant 0 : index
    %c0_6 = arith.constant 0 : index
    %c0_7 = arith.constant 0 : index
    %19 = vector.load %arg5[%c0_5, %c0_6, %c0_7] : memref<2x8x128xi32, #tpu.memory_space<vmem>>, vector<1x8x128xi32>
    %20 = vector.shape_cast %19 : vector<1x8x128xi32> to vector<8x128xi32>
    %c1_i32_8 = arith.constant 1 : i32
    %21 = vector.broadcast %c1_i32_8 : i32 to vector<8x128xi32>
    %22 = arith.cmpi eq, %18, %21 : vector<8x128xi32>
    %23 = arith.extui %22 : vector<8x128xi1> to vector<8x128xi32>
    %24 = arith.addi %20, %23 : vector<8x128xi32>
    %c0_9 = arith.constant 0 : index
    %c0_10 = arith.constant 0 : index
    %c0_11 = arith.constant 0 : index
    %25 = vector.load %arg5[%c0_9, %c0_10, %c0_11] : memref<2x8x128xi32, #tpu.memory_space<vmem>>, vector<1x8x128xi32>
    %26 = vector.shape_cast %25 : vector<1x8x128xi32> to vector<8x128xi32>
    %27 = vector.shape_cast %24 : vector<8x128xi32> to vector<1x8x128xi32>
    tpu.vector_store %arg5[%c0_9, %c0_10, %c0_11], %27 {strides = array<i32>} : memref<2x8x128xi32, #tpu.memory_space<vmem>>, vector<1x8x128xi32>,
    %c1 = arith.constant 1 : index
    %c0_12 = arith.constant 0 : index
    %c0_13 = arith.constant 0 : index
    %28 = vector.load %arg5[%c1, %c0_12, %c0_13] : memref<2x8x128xi32, #tpu.memory_space<vmem>>, vector<1x8x128xi32>
    %29 = vector.shape_cast %28 : vector<1x8x128xi32> to vector<8x128xi32>
    %c2_i32_14 = arith.constant 2 : i32
    %30 = vector.broadcast %c2_i32_14 : i32 to vector<8x128xi32>
    %31 = arith.cmpi eq, %18, %30 : vector<8x128xi32>
    %32 = arith.extui %31 : vector<8x128xi1> to vector<8x128xi32>
    %33 = arith.addi %29, %32 : vector<8x128xi32>
    %c1_15 = arith.constant 1 : index
    %c0_16 = arith.constant 0 : index
    %c0_17 = arith.constant 0 : index
    %34 = vector.load %arg5[%c1_15, %c0_16, %c0_17] : memref<2x8x128xi32, #tpu.memory_space<vmem>>, vector<1x8x128xi32>
    %35 = vector.shape_cast %34 : vector<1x8x128xi32> to vector<8x128xi32>
    %36 = vector.shape_cast %33 : vector<8x128xi32> to vector<1x8x128xi32>
    tpu.vector_store %arg5[%c1_15, %c0_16, %c0_17], %36 {strides = array<i32>} : memref<2x8x128xi32, #tpu.memory_space<vmem>>, vector<1x8x128xi32>,
    %c0_i32_18 = arith.constant 0 : i32
    %37 = arith.cmpi eq, %arg2, %c0_i32_18 : i32
    %38 = arith.extui %37 : i1 to i32
    %c0_i32_19 = arith.constant 0 : i32
    %39 = arith.cmpi ne, %38, %c0_i32_19 : i32
    scf.if %39 {
      %c0_20 = arith.constant 0 : index
      %c0_21 = arith.constant 0 : index
      %c0_22 = arith.constant 0 : index
      %40 = vector.load %arg5[%c0_20, %c0_21, %c0_22] : memref<2x8x128xi32, #tpu.memory_space<vmem>>, vector<2x8x128xi32>
      %cst = arith.constant dense<0> : vector<2x8xi32>
      %41 = vector.multi_reduction <add>, %40, %cst [2] : vector<2x8x128xi32> to vector<2x8xi32>
      %42 = vector.shape_cast %41 : vector<2x8xi32> to vector<2x8x1xi32>
      %cst_23 = arith.constant dense<0> : vector<2x1xi32>
      %43 = vector.multi_reduction <add>, %42, %cst_23 [1] : vector<2x8x1xi32> to vector<2x1xi32>
      %44 = vector.shape_cast %43 : vector<2x1xi32> to vector<2x1x1xi32>
      %45 = vector.shape_cast %44 : vector<2x1x1xi32> to vector<1x2x1x1xi32>
      %c0_24 = arith.constant 0 : index
      %c0_25 = arith.constant 0 : index
      %c0_26 = arith.constant 0 : index
      %c0_27 = arith.constant 0 : index
      %46 = vector.load %arg4[%c0_24, %c0_25, %c0_26, %c0_27] : memref<1x2x1x1xi32, #tpu.memory_space<vmem>>, vector<1x2x1x1xi32>
      tpu.vector_store %arg4[%c0_24, %c0_25, %c0_26, %c0_27], %45 {strides = array<i32>} : memref<1x2x1x1xi32, #tpu.memory_space<vmem>>, vector<1x2x1x1xi32>,
    } else {
    }
    return
  }
  func.func @transform_0(%arg0: i32, %arg1: i32, %arg2: i32) -> (i32, i32, i32, i32) {
    %c1_i32 = arith.constant 1 : i32
    %0 = arith.muli %arg0, %c1_i32 : i32
    %1 = arith.addi %0, %arg2 : i32
    %c0_i32 = arith.constant 0 : i32
    %c0_i32_0 = arith.constant 0 : i32
    %c0_i32_1 = arith.constant 0 : i32
    return %arg1, %c0_i32, %1, %c0_i32_0 : i32, i32, i32, i32
  }
  func.func @transform_1(%arg0: i32, %arg1: i32, %arg2: i32) -> (i32, i32, i32, i32) {
    %c2_i32 = arith.constant 2 : i32
    %0 = arith.muli %arg0, %c2_i32 : i32
    %1 = arith.addi %0, %arg1 : i32
    %c0_i32 = arith.constant 0 : i32
    %c0_i32_0 = arith.constant 0 : i32
    %c0_i32_1 = arith.constant 0 : i32
    %c0_i32_2 = arith.constant 0 : i32
    return %1, %c0_i32, %c0_i32_0, %c0_i32_1 : i32, i32, i32, i32
  }
}

module attributes {stable_mosaic.version = 11 : i64} {
  func.func @_masked_ce_kernel(%arg0: i32, %arg1: i32, %arg2: memref<2xi32, #tpu.memory_space<smem>>, %arg3: memref<1xf32, #tpu.memory_space<smem>>, %arg4: memref<1x3x8x128xf32, #tpu.memory_space<vmem>>, %arg5: memref<1x2x8x128xf32, #tpu.memory_space<vmem>>, %arg6: memref<1x8x128xf32, #tpu.memory_space<vmem>>) attributes {dimension_semantics = [#tpu.dimension_semantics<parallel>, #tpu.dimension_semantics<parallel>], iteration_bounds = array<i64: 2, 2>, scalar_prefetch = 2 : i64, scratch_operands = 0 : i64, tpu.core_type = #tpu.core_type<tc>, window_params = [{transform_indices = @transform_0, window_bounds = array<i64: 1, 3, 8, 128>}, {transform_indices = @transform_1, window_bounds = array<i64: 1, 2, 8, 128>}, {transform_indices = @transform_2, window_bounds = array<i64: 1, 8, 128>}]} {
    %0 = arith.index_cast %arg0 : i32 to index
    %1 = memref.load %arg2[%0] : memref<2xi32, #tpu.memory_space<smem>>
    %c0 = arith.constant 0 : index
    %2 = memref.load %arg3[%c0] : memref<1xf32, #tpu.memory_space<smem>>
    %c0_0 = arith.constant 0 : index
    %c0_1 = arith.constant 0 : index
    %c0_2 = arith.constant 0 : index
    %c0_3 = arith.constant 0 : index
    %3 = vector.load %arg4[%c0_0, %c0_1, %c0_2, %c0_3] : memref<1x3x8x128xf32, #tpu.memory_space<vmem>>, vector<1x3x8x128xf32>
    %4 = vector.shape_cast %3 : vector<1x3x8x128xf32> to vector<3x8x128xf32>
    %c0_4 = arith.constant 0 : index
    %c0_5 = arith.constant 0 : index
    %c0_6 = arith.constant 0 : index
    %c0_7 = arith.constant 0 : index
    %5 = vector.load %arg5[%c0_4, %c0_5, %c0_6, %c0_7] : memref<1x2x8x128xf32, #tpu.memory_space<vmem>>, vector<1x2x8x128xf32>
    %6 = vector.shape_cast %5 : vector<1x2x8x128xf32> to vector<2x8x128xf32>
    %7 = vector.extract_strided_slice %6 {offsets = [0, 0, 0], sizes = [1, 8, 128], strides = [1, 1, 1]} : vector<2x8x128xf32> to vector<1x8x128xf32>
    %8 = vector.shape_cast %7 : vector<1x8x128xf32> to vector<8x128xf32>
    %9 = vector.extract_strided_slice %6 {offsets = [1, 0, 0], sizes = [1, 8, 128], strides = [1, 1, 1]} : vector<2x8x128xf32> to vector<1x8x128xf32>
    %10 = vector.shape_cast %9 : vector<1x8x128xf32> to vector<8x128xf32>
    %11 = arith.cmpf ogt, %10, %8 : vector<8x128xf32>
    %12 = arith.extui %11 : vector<8x128xi1> to vector<8x128xi32>
    %13 = arith.select %11, %10, %8 : vector<8x128xi1>, vector<8x128xf32>
    %14 = arith.select %11, %8, %10 : vector<8x128xi1>, vector<8x128xf32>
    %15 = arith.subf %14, %13 : vector<8x128xf32>
    %16 = math.exp %15 : vector<8x128xf32>
    %cst = arith.constant 1.000000e+00 : f32
    %17 = vector.broadcast %cst : f32 to vector<8x128xf32>
    %18 = arith.addf %17, %16 : vector<8x128xf32>
    %19 = vector.broadcast %2 : f32 to vector<8x128xf32>
    %20 = arith.cmpf ole, %18, %19 : vector<8x128xf32>
    %21 = arith.extui %20 : vector<8x128xi1> to vector<8x128xi32>
    %22 = arith.sitofp %21 : vector<8x128xi32> to vector<8x128xf32>
    %23 = vector.broadcast %1 : i32 to vector<8x128xi32>
    %24 = arith.muli %12, %23 : vector<8x128xi32>
    %25 = vector.extract_strided_slice %4 {offsets = [0, 0, 0], sizes = [1, 8, 128], strides = [1, 1, 1]} : vector<3x8x128xf32> to vector<1x8x128xf32>
    %26 = vector.shape_cast %25 : vector<1x8x128xf32> to vector<8x128xf32>
    %27 = vector.extract_strided_slice %4 {offsets = [1, 0, 0], sizes = [1, 8, 128], strides = [1, 1, 1]} : vector<3x8x128xf32> to vector<1x8x128xf32>
    %28 = vector.shape_cast %27 : vector<1x8x128xf32> to vector<8x128xf32>
    %29 = arith.maximumf %26, %28 : vector<8x128xf32>
    %30 = vector.extract_strided_slice %4 {offsets = [2, 0, 0], sizes = [1, 8, 128], strides = [1, 1, 1]} : vector<3x8x128xf32> to vector<1x8x128xf32>
    %31 = vector.shape_cast %30 : vector<1x8x128xf32> to vector<8x128xf32>
    %32 = arith.maximumf %29, %31 : vector<8x128xf32>
    %33 = vector.extract_strided_slice %4 {offsets = [0, 0, 0], sizes = [1, 8, 128], strides = [1, 1, 1]} : vector<3x8x128xf32> to vector<1x8x128xf32>
    %34 = vector.shape_cast %33 : vector<1x8x128xf32> to vector<8x128xf32>
    %35 = arith.subf %34, %32 : vector<8x128xf32>
    %36 = math.exp %35 : vector<8x128xf32>
    %37 = vector.extract_strided_slice %4 {offsets = [1, 0, 0], sizes = [1, 8, 128], strides = [1, 1, 1]} : vector<3x8x128xf32> to vector<1x8x128xf32>
    %38 = vector.shape_cast %37 : vector<1x8x128xf32> to vector<8x128xf32>
    %39 = arith.subf %38, %32 : vector<8x128xf32>
    %40 = math.exp %39 : vector<8x128xf32>
    %41 = arith.addf %36, %40 : vector<8x128xf32>
    %c1_i32 = arith.constant 1 : i32
    %42 = vector.broadcast %c1_i32 : i32 to vector<8x128xi32>
    %43 = arith.cmpi eq, %24, %42 : vector<8x128xi32>
    %44 = arith.select %43, %39, %35 : vector<8x128xi1>, vector<8x128xf32>
    %45 = vector.extract_strided_slice %4 {offsets = [2, 0, 0], sizes = [1, 8, 128], strides = [1, 1, 1]} : vector<3x8x128xf32> to vector<1x8x128xf32>
    %46 = vector.shape_cast %45 : vector<1x8x128xf32> to vector<8x128xf32>
    %47 = arith.subf %46, %32 : vector<8x128xf32>
    %48 = math.exp %47 : vector<8x128xf32>
    %49 = arith.addf %41, %48 : vector<8x128xf32>
    %c2_i32 = arith.constant 2 : i32
    %50 = vector.broadcast %c2_i32 : i32 to vector<8x128xi32>
    %51 = arith.cmpi eq, %24, %50 : vector<8x128xi32>
    %52 = arith.select %51, %47, %44 : vector<8x128xi1>, vector<8x128xf32>
    %53 = math.log %49 : vector<8x128xf32>
    %54 = arith.subf %53, %52 : vector<8x128xf32>
    %55 = arith.mulf %54, %22 : vector<8x128xf32>
    %56 = vector.shape_cast %55 : vector<8x128xf32> to vector<1x8x128xf32>
    %c0_8 = arith.constant 0 : index
    %c0_9 = arith.constant 0 : index
    %c0_10 = arith.constant 0 : index
    %57 = vector.load %arg6[%c0_8, %c0_9, %c0_10] : memref<1x8x128xf32, #tpu.memory_space<vmem>>, vector<1x8x128xf32>
    tpu.vector_store %arg6[%c0_8, %c0_9, %c0_10], %56 {strides = array<i32>} : memref<1x8x128xf32, #tpu.memory_space<vmem>>, vector<1x8x128xf32>,
    return
  }
  func.func @transform_0(%arg0: i32, %arg1: i32, %arg2: memref<2xi32, #tpu.memory_space<smem>>, %arg3: memref<1xf32, #tpu.memory_space<smem>>) -> (i32, i32, i32, i32) {
    %c0_i32 = arith.constant 0 : i32
    %c0_i32_0 = arith.constant 0 : i32
    %c0_i32_1 = arith.constant 0 : i32
    return %arg0, %c0_i32, %arg1, %c0_i32_0 : i32, i32, i32, i32
  }
  func.func @transform_1(%arg0: i32, %arg1: i32, %arg2: memref<2xi32, #tpu.memory_space<smem>>, %arg3: memref<1xf32, #tpu.memory_space<smem>>) -> (i32, i32, i32, i32) {
    %c0_i32 = arith.constant 0 : i32
    %c0_i32_0 = arith.constant 0 : i32
    %c0_i32_1 = arith.constant 0 : i32
    return %arg0, %c0_i32, %arg1, %c0_i32_0 : i32, i32, i32, i32
  }
  func.func @transform_2(%arg0: i32, %arg1: i32, %arg2: memref<2xi32, #tpu.memory_space<smem>>, %arg3: memref<1xf32, #tpu.memory_space<smem>>) -> (i32, i32, i32) {
    %c0_i32 = arith.constant 0 : i32
    %c0_i32_0 = arith.constant 0 : i32
    return %arg0, %arg1, %c0_i32 : i32, i32, i32
  }
}

</mosaic_0001>

<bundles_post_ra>
// kernel: sam_semi_supervised_loss.2
= control target key start
LH: loop header
LB: loop body
LE: loop exit
PB: predicated region body
PF: predicated region fallthrough
CT: control target
= control target key end

     0   :  { %s486_s6 = smov 0   ;;  %s488_s7 = smov 0   ;;  %s575_s0 = inlined_call_operand.vmem [shape: f32[2,3,16,128], index: 0, kind: input, shape index: {}]   ;;  %s576_s1 = inlined_call_operand.vmem [shape: s32[4,2,1,1], index: 1, kind: output, shape index: {}]  }
   0x1   :  { %s490_s8 = smov 0   ;;  %s492_s9 = smov 0  }
   0x2   :  { %s494_s10 = smov 0   ;;  %s496_s11 = smov 0  }
   0x3   :  { %s498_s12 = smov 0  }
   0x4 LB: > { %s26_s13 = sadd.s32 1, %s465_s10  ;;  %s30_s14 = sadd.s32 1, %s469_s11  ;;  %s473_s12 = sphi %s498_s12, %s11_s12   ;;  %s469_s11 = sphi %s496_s11, %s582_s11   ;;  %s465_s10 = sphi %s494_s10, %s581_s10   ;;  %s461_s9 = sphi %s492_s9, %s580_s9   ;;  %s457_s8 = sphi %s490_s8, %s579_s8   ;;  %s453_s7 = sphi %s488_s7, %s578_s7   ;;  %s449_s6 = sphi %s486_s6, %s577_s6  }
   0x5   : > { %p28_p0 = scmp.ge.s32.totalorder %s26_s13, 2  ;;  %p48_p1 = scmp.ne.s32.totalorder %s453_s7, %s449_s6 }
   0x6   : > { %p49_p2 = scmp.eq.s32.totalorder %s473_s12, 0  ;;  %s41_s18 = sadd.s32 1, %s453_s7 }
   0x7   : > { %s584_s13 = smov (%p28_p0, %s26_s13), 0  ;;  %s586_s14 = smov (!%p28_p0, %s30_s14), %s469_s11 }
   0x8   : > { %p50_p3 = por %p49_p2, %p48_p1  ;;  %p32_p4 = scmp.ge.s32.totalorder %s586_s14, 2 }
   0x9   : > { %s36_s15 = ssub.s32 %s465_s10, %s584_s13  ;;  %p352_p6 = scmp.ge.s32.totalorder %s473_s12, 4 }
   0xa   : > { %s588_s14 = smov (%p32_p4, %s586_s14), 0 }
   0xb   : > { %s37_s16 = ssub.s32 %s469_s11, %s588_s14  ;;  %104 = sbr.rel (%p352_p6) target bundleno = 26 (0x1a), region = 16 }
   0xc   : > { %s38_s17 = sor.u32 %s37_s16, %s36_s15 }
   0xd   : > { %p39_p5 = scmp.eq.s32.totalorder %s38_s17, 0 }
   0xf   : > { %s537_s19 = scalar_select %p39_p5, %s453_s7, %s41_s18  }
  0x10   : > { %107 = sbr.rel (!%p50_p3) target bundleno = 26 (0x1a), region = 20  ;;  %s109_s20 = sand.u32 (%p50_p3), 1, %s453_s7  }
  0x11   : > { %s360_s21 = smul.u32 (%p50_p3), 6, %s465_s10 }
  0x12   : > { %s359_s22 = smul.u32 (%p50_p3), 24, %s109_s20 }
  0x13   : > { %s114_s23 = sadd.s32 (%p50_p3), %s469_s11, %s360_s21 }
  0x14   : > { %s353_s24 = sshll.u32 (%p50_p3), %s114_s23, 3  ;;  %s111_s28 = scalar_lea.vmem (%p50_p3), [#allocation3], %s359_s22 }
  0x15   : > { %s116_s27 = scalar_lea.vmem %s575_s0, %s353_s24 }
  0x16   : > { %v149_v0 = vld [vmem:[%s116_s27] sm:$0xff]  ;;  %v151_v1 = vld [vmem:[%s116_s27 + $0x10] sm:$0xff] }
  0x17   : > { %v153_v2 = vld [vmem:[%s116_s27 + $0x20] sm:$0xff]  ;;  %150 = vst [vmem:[%s111_s28] sm:$0xff] %v149_v0 }
  0x18   : > { %152 = vst [vmem:[%s111_s28 + $0x8] sm:$0xff] %v151_v1 }
  0x19   : > { %154 = vst [vmem:[%s111_s28 + $0x10] sm:$0xff] %v153_v2 }
  0x1a PF: > { %p354_p7 = scmp.ge.s32.totalorder %s473_s12, 1  ;;  %p159_p8 = scmp.lt.s32.totalorder %s473_s12, 5 }
  0x1c   : > { %p160_p9 = pnand %p354_p7, %p159_p8 }
  0x1d   : > { %s166_s29 = sand.u32 (!%p160_p9), 1, %s449_s6   ;;  %s355_s3 = sshll.u32 (!%p160_p9), %s461_s9, 1 }
  0x1e   : > { %163 = sbr.rel (%p160_p9) target bundleno = 189 (0xbd), region = 58  ;;  %s188_s4 = sadd.s32 (!%p160_p9), %s457_s8, %s355_s3 }
  0x1f   : > { %s361_s30 = smul.u32 (!%p160_p9), 24, %s166_s29  ;;  %p189_p10 = scmp.lt.s32.totalorder (!%p160_p9), %s188_s4, 3 }
  0x21   : > { %s168_s2 = scalar_lea.vmem (!%p160_p9), [#allocation3], %s361_s30 }
  0x23   : > { %v201_v3 = vld [vmem:[%s168_s2] sm:$0xff]  ;;  %v202_v4 = vld [vmem:[%s168_s2 + $0x8] sm:$0xff]  ;;  %v203_v5 = vld [vmem:[%s168_s2 + $0x10] sm:$0xff]  ;;  %v475_v7 = vmov 0   ;;  %s590_s4 = smov (!%p189_p10, %s188_s4), 3  ;;  %vm261_vm4 = vcmask 0  }
  0x24   : > { %vm204_vm0 = vcmp.gt.f32.partialorder %v202_v4, %v201_v3  ;;  %s356_s5 = sshll.u32 %s590_s4, 1 }
  0x25   : > { %v205_v6 = vsel %vm204_vm0, %v202_v4, %v201_v3  ;;  %v206_v8 = vsel %vm204_vm0, 1, %v475_v7  ;;  %s192_s8 = scalar_lea.vmem %s576_s1, %s356_s5 }
  0x26   : > { %vm207_vm1 = vcmp.gt.f32.partialorder %v203_v5, %v205_v6 }
  0x27   : > { %v208_v9 = vsel %vm207_vm1, 2, %v206_v8 }
  0x28   : > { %vm210_vm2 = vcmp.eq.s32.totalorder %v208_v9, 1  ;;  %vm216_vm3 = vcmp.eq.s32.totalorder %v208_v9, 2 }
  0x29   : > { %v211_v10 = vsel %vm210_vm2, 1, %v475_v7  ;;  %v217_v13 = vsel %vm216_vm3, 1, %v475_v7 }
  0x2a   : > { %v226_v11 = vshrl.u32 %v211_v10, 16  ;;  %v225_v12 = vand.u32 65535, %v211_v10  ;;  %v238_v16 = vshrl.u32 %v217_v13, 16  ;;  %v237_v17 = vand.u32 65535, %v217_v13 }
  0x2c   : > { %v228_v14 = vcvt.s32.f32 %v226_v11  ;;  %v227_v15 = vcvt.s32.f32 %v225_v12  ;;  %v240_v18 = vcvt.s32.f32 %v238_v16  ;;  %v239_v19 = vcvt.s32.f32 %v237_v17 }
  0x2e   : > { %231 = vadd.xlane.f32.xlu0 %v228_v14  ;;  %229 = vadd.xlane.f32.xlu1 %v227_v15 }
  0x36   : > { %243 = vadd.xlane.f32.xlu0 %v240_v18  ;;  %241 = vadd.xlane.f32.xlu1 %v239_v19 }
  0xa1   : > { %v232_v20 = vpop.xlane.xlu0 %231  ;;  %v230_v21 = vpop.xlane.xlu1 %229 }
  0xa2   : > { %v234_v22 = vcvt.f32.s32 %v232_v20  ;;  %v233_v23 = vcvt.f32.s32 %v230_v21 }
  0xa4   : > { %v235_v24 = vshll.u32 %v234_v22, 16 }
  0xa6   : > { %v236_v25 = vadd.s32 %v235_v24, %v233_v23 }
  0xa8   : > { %v249_v26 = vrot.slane %v236_v25, 4 }
  0xa9   : > { %v244_v27 = vpop.xlane.xlu0 %243  ;;  %v242_v28 = vpop.xlane.xlu1 %241 }
  0xaa   : > { %v250_v29 = vadd.s32 %v249_v26, %v236_v25  ;;  %v246_v30 = vcvt.f32.s32 %v244_v27  ;;  %v245_v31 = vcvt.f32.s32 %v242_v28 }
  0xac   : > { %v251_v32 = vrot.slane %v250_v29, 2  ;;  %v247_v33 = vshll.u32 %v246_v30, 16 }
  0xae   : > { %v252_v34 = vadd.s32 %v251_v32, %v250_v29  ;;  %v248_v35 = vadd.s32 %v247_v33, %v245_v31 }
  0xb0   : > { %v253_v36 = vrot.slane %v252_v34, 1  ;;  %v255_v37 = vrot.slane %v248_v35, 4 }
  0xb2   : > { %v254_v38 = vadd.s32 %v253_v36, %v252_v34  ;;  %v256_v39 = vadd.s32 %v255_v37, %v248_v35 }
  0xb4   : > { %262 = vst.msk [vmem:[%s192_s8] sm:$0x1] %vm261_vm4, %v254_v38  ;;  %v257_v40 = vrot.slane %v256_v39, 2 }
  0xb6   : > { %v258_v41 = vadd.s32 %v257_v40, %v256_v39 }
  0xb8   : > { %v259_v42 = vrot.slane %v258_v41, 1 }
  0xba   : > { %v260_v43 = vadd.s32 %v259_v42, %v258_v41 }
  0xbc   : > { %263 = vst.msk [vmem:[%s192_s8 + $0x1] sm:$0x1] %vm261_vm4, %v260_v43 }
  0xbd PF: > { %s11_s12 = sadd.s32 1, %s473_s12   ;;  %s577_s6 = smov %s453_s7 }
  0xbe   : > { %p8_p11 = scmp.ge.s32.totalorder %s11_s12, 6   ;;  %s578_s7 = smov %s537_s19 }
  0xbf   : > { %s579_s8 = smov %s465_s10  ;;  %s580_s9 = smov %s469_s11 }
  0xc0   : > { %s581_s10 = smov %s584_s13  ;;  %s582_s11 = smov %s588_s14 }
  0xc1   :  { %10 = sbr.rel (!%p8_p11) target bundleno = 4 (0x4), region = 106 }

// kernel: sam_semi_supervised_loss.3
= control target key start
LH: loop header
LB: loop body
LE: loop exit
PB: predicated region body
PF: predicated region fallthrough
CT: control target
= control target key end

     0   :  { %s593_s20 = smov [#allocation3]   ;;  %s736_s0 = inlined_call_operand.vmem [shape: s32[2], index: 0, kind: input, shape index: {}]   ;;  %s737_s1 = inlined_call_operand.<no memory space> [shape: f32[1], index: 1, kind: input, shape index: {}]   ;;  %s738_s2 = inlined_call_operand.vmem [shape: f32[2,3,16,128], index: 2, kind: input, shape index: {}]   ;;  %s739_s3 = inlined_call_operand.vmem [shape: f32[2,2,16,128], index: 3, kind: input, shape index: {}]   ;;  %s740_s4 = inlined_call_operand.vmem [shape: f32[2,16,128], index: 4, kind: output, shape index: {}]  }
   0x1   :  { %s10_s17 = sshll.u32 %s736_s0, 4  ;;  %14 = sst [smem:[#allocation4]] %s737_s1  ;;  %s11_s17 = int_to_ptr.vmem [resolvable:$true] %s10_s17 }
   0x2   :  { %13 = dma.vmem_to_smem %s11_s17, 16, %s593_s20, [#allocation2] }
   0x3   :  { %563 = dma.done.wait [#allocation2], 16 }
   0x4   :  { %564 = vsyncadd [#allocation2], 4294967280 }
   0x5   :  { %17 = sfence }
   0x6   :  { %s627_s21 = smov 0   ;;  %s629_s22 = smov 0  }
   0x7   :  { %s631_s23 = smov 0   ;;  %s633_s24 = smov 0  }
   0x8   :  { %s635_s25 = smov 0   ;;  %s637_s0 = smov 0  }
   0x9   :  { %s639_s26 = smov 0  }
   0xa LB: > { %s32_s1 = sadd.s32 1, %s583_s25  ;;  %s35_s27 = sadd.s32 1, %s587_s0  ;;  %s591_s26 = sphi %s639_s26, %s23_s26   ;;  %s587_s0 = sphi %s637_s0, %s747_s0   ;;  %s583_s25 = sphi %s635_s25, %s746_s25   ;;  %s579_s24 = sphi %s633_s24, %s745_s24   ;;  %s575_s23 = sphi %s631_s23, %s744_s23   ;;  %s571_s22 = sphi %s629_s22, %s743_s22   ;;  %s567_s21 = sphi %s627_s21, %s742_s21  }
   0xb   : > { %p33_p0 = scmp.ge.s32.totalorder %s32_s1, 2  ;;  %p51_p1 = scmp.ne.s32.totalorder %s571_s22, %s567_s21 }
   0xc   : > { %p52_p2 = scmp.eq.s32.totalorder %s591_s26, 0  ;;  %s44_s6 = sadd.s32 1, %s571_s22 }
   0xd   : > { %s749_s1 = smov (%p33_p0, %s32_s1), 0  ;;  %s751_s27 = smov (!%p33_p0, %s35_s27), %s587_s0 }
   0xe   : > { %p670_p3 = por %p52_p2, %p51_p1  ;;  %p37_p4 = scmp.ge.s32.totalorder %s751_s27, 2 }
   0xf   : > { %s40_s29 = ssub.s32 %s583_s25, %s749_s1  ;;  %p439_p6 = scmp.ge.s32.totalorder %s591_s26, 4 }
  0x10   : > { %s753_s27 = smov (%p37_p4, %s751_s27), 0 }
  0x11   : > { %s39_s30 = ssub.s32 %s587_s0, %s753_s27  ;;  %133 = sbr.rel (%p439_p6) target bundleno = 40 (0x28), region = 16 }
  0x12   : > { %s41_s5 = sor.u32 %s40_s29, %s39_s30 }
  0x13   : > { %p42_p5 = scmp.eq.s32.totalorder %s41_s5, 0 }
  0x15   : > { %s682_s7 = scalar_select %p42_p5, %s571_s22, %s44_s6  }
  0x16   : > { %136 = sbr.rel (!%p670_p3) target bundleno = 32 (0x20), region = 20  ;;  %s138_s8 = sand.u32 (%p670_p3), 1, %s571_s22  }
  0x17   : > { %s452_s9 = smul.u32 (%p670_p3), 6, %s587_s0 }
  0x18   : > { %s451_s10 = smul.u32 (%p670_p3), 24, %s138_s8 }
  0x19   : > { %s142_s11 = sadd.s32 (%p670_p3), %s583_s25, %s452_s9 }
  0x1a   : > { %s440_s12 = sshll.u32 (%p670_p3), %s142_s11, 3  ;;  %s140_s16 = scalar_lea.vmem (%p670_p3), [#allocation5], %s451_s10 }
  0x1b   : > { %s144_s15 = scalar_lea.vmem %s738_s2, %s440_s12 }
  0x1c   : > { %v177_v0 = vld [vmem:[%s144_s15] sm:$0xff]  ;;  %v179_v1 = vld [vmem:[%s144_s15 + $0x10] sm:$0xff] }
  0x1d   : > { %v181_v2 = vld [vmem:[%s144_s15 + $0x20] sm:$0xff]  ;;  %178 = vst [vmem:[%s140_s16] sm:$0xff] %v177_v0 }
  0x1e   : > { %180 = vst [vmem:[%s140_s16 + $0x8] sm:$0xff] %v179_v1 }
  0x1f   : > { %182 = vst [vmem:[%s140_s16 + $0x10] sm:$0xff] %v181_v2 }
  0x20 PF: > { %188 = sbr.rel (!%p670_p3) target bundleno = 40 (0x28), region = 58  ;;  %s190_s17 = sand.u32 (%p670_p3), 1, %s571_s22  }
  0x21   : > { %s442_s18 = sshll.u32 (%p670_p3), %s587_s0, 2  ;;  %s441_s19 = sshll.u32 (%p670_p3), %s190_s17, 4 }
  0x22   : > { %s194_s20 = sadd.s32 (%p670_p3), %s583_s25, %s442_s18  ;;  %s192_s8 = scalar_lea.vmem (%p670_p3), [#allocation6], %s441_s19 }
  0x23   : > { %s443_s29 = sshll.u32 (%p670_p3), %s194_s20, 3 }
  0x24   : > { %s196_s6 = scalar_lea.vmem (%p670_p3), %s739_s3, %s443_s29 }
  0x25   : > { %v227_v3 = vld [vmem:[%s196_s6] sm:$0xff]  ;;  %v229_v4 = vld [vmem:[%s196_s6 + $0x10] sm:$0xff] }
  0x26   : > { %228 = vst [vmem:[%s192_s8] sm:$0xff] %v227_v3 }
  0x27   : > { %230 = vst [vmem:[%s192_s8 + $0x8] sm:$0xff] %v229_v4 }
  0x28 PF: > { %p444_p7 = scmp.ge.s32.totalorder %s591_s26, 1  ;;  %p235_p8 = scmp.lt.s32.totalorder %s591_s26, 5 }
  0x2a   : > { %p236_p9 = pnand %p444_p7, %p235_p8 }
  0x2b   : > { %s242_s28 = sand.u32 (!%p236_p9), 1, %s567_s21   ;;  %s285_s21 = sld [smem:[#allocation3 + %s579_s24]] (!%p236_p9) }
  0x2c   : > { %239 = sbr.rel (%p236_p9) target bundleno = 85 (0x55), region = 96  ;;  %s445_s10 = sshll.u32 (!%p236_p9), %s242_s28, 4 }
  0x2d   : > { %s453_s9 = smul.u32 (!%p236_p9), 24, %s242_s28  ;;  %s251_s11 = scalar_lea.vmem (!%p236_p9), [#allocation6], %s445_s10 }
  0x2e   : > { %p277_p10 = scmp.lt.s32.totalorder (!%p236_p9), %s579_s24, 1  ;;  %s286_s13 = sld [smem:[#allocation4]] (!%p236_p9) }
  0x2f   : > { %s244_s12 = scalar_lea.vmem (!%p236_p9), [#allocation5], %s453_s9  ;;  %p279_p11 = scmp.lt.s32.totalorder (!%p236_p9), %s575_s23, 1 }
  0x31   : > { %v290_v5 = vld [vmem:[%s251_s11] sm:$0xff]  ;;  %v291_v6 = vld [vmem:[%s251_s11 + $0x8] sm:$0xff]  ;;  %v287_v7 = vld [vmem:[%s244_s12] sm:$0xff]  ;;  %v594_v22 = vmov 0   ;;  %v304_v24 = vstv %s285_s21  ;;  %s755_s24 = smov (!%p277_p10, %s579_s24), 1  ;;  %s757_s23 = smov (!%p279_p11, %s575_s23), 1 }
  0x32   : > { %v288_v8 = vld [vmem:[%s244_s12 + $0x8] sm:$0xff]  ;;  %v289_v9 = vld [vmem:[%s244_s12 + $0x10] sm:$0xff]  ;;  %vm292_vm0 = vcmp.gt.f32.partialorder %v291_v6, %v290_v5  ;;  %s446_s14 = sshll.u32 %s755_s24, 1  ;;  %v595_v38 = vmov 0.0  }
  0x33   : > { %v306_v10 = vmax.f32 %v287_v7, %v288_v8  ;;  %v294_v11 = vsel %vm292_vm0, %v291_v6, %v290_v5  ;;  %v295_v12 = vsel %vm292_vm0, %v290_v5, %v291_v6  ;;  %v293_v23 = vsel %vm292_vm0, 1, %v594_v22  ;;  %s282_s15 = sadd.s32 %s446_s14, %s757_s23 }
  0x34   : > { %v296_v14 = vsub.f32 %v295_v12, %v294_v11  ;;  %v305_v28 = vmul.u32 %v304_v24, %v293_v23  ;;  %v300_v33 = vstv %s286_s13  ;;  %s447_s16 = sshll.u32 %s282_s15, 3 }
  0x35   : > { %v307_v13 = vmax.f32 %v306_v10, %v289_v9  ;;  %s284_s19 = scalar_lea.vmem %s740_s4, %s447_s16 }
  0x36   : > { %v297_v21 = vmul.f32 1.442695, %v296_v14  ;;  %vm315_vm1 = vcmp.eq.s32.totalorder %v305_v28, 1  ;;  %vm321_vm2 = vcmp.eq.s32.totalorder %v305_v28, 2 }
  0x37   : > { %v308_v15 = vsub.f32 %v287_v7, %v307_v13  ;;  %v311_v16 = vsub.f32 %v288_v8, %v307_v13  ;;  %v317_v17 = vsub.f32 %v289_v9, %v307_v13 }
  0x39   : > { %v309_v18 = vmul.f32 1.442695, %v308_v15  ;;  %v312_v19 = vmul.f32 1.442695, %v311_v16  ;;  %v318_v20 = vmul.f32 1.442695, %v317_v17  ;;  %v316_v34 = vsel %vm315_vm1, %v311_v16, %v308_v15 }
  0x3a   : > { %v322_v36 = vsel %vm321_vm2, %v317_v17, %v316_v34 }
  0x3b   : > { %513 = vpow2.f32 %v309_v18 }
  0x3c   : > { %515 = vpow2.f32 %v312_v19 }
  0x3d   : > { %517 = vpow2.f32 %v318_v20 }
  0x3e   : > { %519 = vpow2.f32 %v297_v21 }
  0x41   : > { %v514_v25 = vpop.eup %513 }
  0x42   : > { %v516_v26 = vpop.eup %515 }
  0x43   : > { %v518_v27 = vpop.eup %517  ;;  %v314_v29 = vadd.f32 %v516_v26, %v514_v25 }
  0x44   : > { %v520_v30 = vpop.eup %519 }
  0x45   : > { %v320_v31 = vadd.f32 %v518_v27, %v314_v29  ;;  %v299_v32 = vadd.f32 1.0, %v520_v30 }
  0x47   : > { %521 = vlog2.f32 %v320_v31  ;;  %vm301_vm3 = vcmp.le.f32.partialorder %v299_v32, %v300_v33 }
  0x48   : > { %v448_v39 = vsel %vm301_vm3, 1.0, %v595_v38 }
  0x4d   : > { %v522_v35 = vpop.eup %521 }
  0x4e   : > { %v324_v37 = vmul.f32 0.6931472, %v522_v35 }
  0x50   : > { %v325_v40 = vsub.f32 %v324_v37, %v322_v36 }
  0x52   : > { %v326_v41 = vmul.f32 %v448_v39, %v325_v40 }
  0x54   : > { %327 = vst [vmem:[%s284_s19] sm:$0xff] %v326_v41 }
  0x55 PF: > { %s23_s26 = sadd.s32 1, %s591_s26   ;;  %s742_s21 = smov %s571_s22 }
  0x56   : > { %p20_p12 = scmp.ge.s32.totalorder %s23_s26, 6   ;;  %s743_s22 = smov %s682_s7 }
  0x57   : > { %s744_s23 = smov %s583_s25  ;;  %s745_s24 = smov %s587_s0 }
  0x58   : > { %s746_s25 = smov %s749_s1  ;;  %s747_s0 = smov %s753_s27 }
  0x59   :  { %22 = sbr.rel (!%p20_p12) target bundleno = 10 (0xa), region = 147 }

</bundles_post_ra>
